<compile_context>
chip_gen: v7x
topology: tpu7x:2x2x1
jax: 0.10.0
libtpu: 0.0.40
codegen_flags: <defaults>
</compile_context>

<pallas_src>
from functools import partial

import jax
import jax.numpy as jnp
from jax.experimental import pallas as pl
from jax.experimental.pallas import tpu as pltpu

# ----------------------------- synthetic "map" config -----------------------------
N_AGENTS = 3
N_ENEMIES = 3
E_ENEMY_DIM = 5
E_ALLY_DIM = 5
OWN_FEATS = 3
INPUT_SHAPE = 4 + N_ENEMIES * E_ENEMY_DIM + (N_AGENTS - 1) * E_ALLY_DIM + OWN_FEATS  # 32
RNN_HIDDEN_DIM = 32
N_ACTIONS = 6 + N_ENEMIES  # 9

OUT_WIDTH = 128       # lane-dense packed output slab width (one full vreg of lanes)
Q_LLM_OFFSET = 64     # q_LLM occupies columns [64, 64 + N_ACTIONS) of the slab
H_OFFSET = 96         # h_new occupies columns [96, 128) of the slab
TM_MAX = 4096         # row tile; ~6 MiB double-buffered -> fits every chip's scoped VMEM default


def _round_up(x, m):
    return (x + m - 1) // m * m


# ----------------------------- fused kernel -----------------------------
def _fused_kernel(x_ref, idx_ref, h_ref,
                  w1_ref, b1_ref, wgi_ref, wgh_ref, bg_ref, w2_ref, b2_ref,
                  out_ref, *, hidden_dim, q_llm_off, h_off):
    H = hidden_dim
    x = x_ref[...]          # (tm, e)  f32
    h = h_ref[...]          # (tm, H)  f32

    # ---- fc1 + ReLU (bf16 operands on the MXU, f32 accumulation / elementwise) ----
    y = jnp.dot(x.astype(jnp.bfloat16), w1_ref[...],
                preferred_element_type=jnp.float32) + b1_ref[...]
    y = jnp.maximum(y, 0.0)

    # ---- GRUCell: two accumulated K=H dots (no lane-axis concat of y and h) ----
    # gate layout of g (N = 4H = 128):
    #   g[:, 0:H]   = i_r + h_r (+ b_ih_r + b_hh_r)
    #   g[:, H:2H]  = i_z + h_z (+ b_ih_z + b_hh_z)
    #   g[:, 2H:3H] = i_n       (+ b_ih_n)
    #   g[:, 3H:4H] = h_n       (+ b_hh_n)
    g = (jnp.dot(y.astype(jnp.bfloat16), wgi_ref[...], preferred_element_type=jnp.float32)
         + jnp.dot(h.astype(jnp.bfloat16), wgh_ref[...], preferred_element_type=jnp.float32)
         + bg_ref[...])
    r = jax.nn.sigmoid(g[:, 0:H])
    z = jax.nn.sigmoid(g[:, H:2 * H])
    n = jnp.tanh(g[:, 2 * H:3 * H] + r * g[:, 3 * H:4 * H])
    h_new = (1.0 - z) * n + z * h                       # f32 recurrent state

    # ---- fc2 into the lane-dense 128-wide slab (w2/b2 zero-padded past n_actions) ----
    q = jnp.dot(h_new.astype(jnp.bfloat16), w2_ref[...],
                preferred_element_type=jnp.float32) + b2_ref[...]        # (tm, 128)

    # ---- decentralized q_LLM selection (VPU filler under the HBM-bound body) ----
    # dead -> one-hot(no-op action 0); alive -> the reference's exception-path zeros.
    # TODO(synk): for alive agents the reference queries an external LLM and parses a
    # one-hot action from text; no Pallas equivalent exists, so alive rows emit the
    # deterministic exception-path fallback of inputs2action (all zeros).
    tm, e = x.shape
    alive_idx = idx_ref[...]                                  # (tm, 1) int32, from wrapper
    # TODO(synk): alive_idx is not bounds-checked; an out-of-range index silently
    # classifies the row as dead, whereas the PyTorch reference would raise.
    col_ids = jax.lax.broadcasted_iota(jnp.int32, (tm, e), 1)
    alive_val = jnp.sum(jnp.where(col_ids == alive_idx, x, 0.0), axis=-1, keepdims=True)
    dead = (alive_val == 0.0).astype(jnp.float32)             # (tm, 1)

    onehot_row = (jax.lax.broadcasted_iota(jnp.int32, (1, OUT_WIDTH), 1)
                  == q_llm_off).astype(jnp.float32)           # (1, 128) constant row

    # place h_new at lanes [h_off : h_off+H] (q is exactly 0 there: padded w2/b2)
    h_slab = jnp.concatenate(
        [jnp.zeros((tm, h_off), jnp.float32), h_new], axis=-1)          # (tm, 128)

    # packed slab: [0:n_act]=q_net, [q_llm_off:q_llm_off+n_act]=q_LLM, [h_off:128]=h_new
    out_ref[...] = q + dead * onehot_row + h_slab


# ----------------------------- parameter init (deterministic, PyTorch-style) -----------------------------
def init_params(key):
    ks = jax.random.split(key, 8)
    e, h, a = INPUT_SHAPE, RNN_HIDDEN_DIM, N_ACTIONS
    lin1_b = 1.0 / jnp.sqrt(e)
    gru_b = 1.0 / jnp.sqrt(h)
    lin2_b = 1.0 / jnp.sqrt(h)
    u = lambda k, shape, bnd: jax.random.uniform(k, shape, jnp.float32, -bnd, bnd)
    return {
        # fc1: Linear(e, h)   (stored transposed: (in, out))
        "w1": u(ks[0], (e, h), lin1_b),
        "b1": u(ks[1], (1, h), lin1_b),
        # GRUCell(h, h): weight_ih/weight_hh stored (in, 3h), gate order (r, z, n)
        "w_ih": u(ks[2], (h, 3 * h), gru_b),
        "w_hh": u(ks[3], (h, 3 * h), gru_b),
        "b_ih": u(ks[4], (1, 3 * h), gru_b),
        "b_hh": u(ks[5], (1, 3 * h), gru_b),
        # fc2: Linear(h, n_actions)
        "w2": u(ks[6], (h, a), lin2_b),
        "b2": u(ks[7], (1, a), lin2_b),
    }


def pack_params(p):
    """Pack into the fused/padded layout the kernel consumes (weights bf16, biases f32)."""
    H = RNN_HIDDEN_DIM
    # input-side gate weights -> columns (r, z, n, 0)
    wgi = jnp.zeros((H, 4 * H), jnp.float32)
    wgi = wgi.at[:, 0:3 * H].set(p["w_ih"])
    # hidden-side gate weights -> columns (r, z, 0, n)
    wgh = jnp.zeros((H, 4 * H), jnp.float32)
    wgh = wgh.at[:, 0:2 * H].set(p["w_hh"][:, 0:2 * H])
    wgh = wgh.at[:, 3 * H:4 * H].set(p["w_hh"][:, 2 * H:3 * H])

    bg = jnp.zeros((1, 4 * H), jnp.float32)
    bg = bg.at[:, 0:2 * H].set(p["b_ih"][:, 0:2 * H] + p["b_hh"][:, 0:2 * H])
    bg = bg.at[:, 2 * H:3 * H].set(p["b_ih"][:, 2 * H:3 * H])
    bg = bg.at[:, 3 * H:4 * H].set(p["b_hh"][:, 2 * H:3 * H])

    w2p = jnp.zeros((H, OUT_WIDTH), jnp.float32).at[:, :N_ACTIONS].set(p["w2"])
    b2p = jnp.zeros((1, OUT_WIDTH), jnp.float32).at[:, :N_ACTIONS].set(p["b2"])

    return {
        "w1": p["w1"].astype(jnp.bfloat16),
        "b1": p["b1"],
        "wgi": wgi.astype(jnp.bfloat16),
        "wgh": wgh.astype(jnp.bfloat16),
        "bg": bg,
        "w2p": w2p.astype(jnp.bfloat16),
        "b2p": b2p,
    }


# ----------------------------- forward (matches module.forward semantics) -----------------------------
def nrnn_agent_forward(pparams, inputs, ava_actions, coord, hidden):
    del ava_actions  # only shapes the LLM prompt text; unused by the deterministic path
    b, a, e = inputs.shape
    ba = b * a
    x = inputs.reshape(ba, e)
    c = coord.reshape(ba, 8)
    h = hidden.reshape(ba, RNN_HIDDEN_DIM)

    # per-row alive-flag column index from coord (4 B/row instead of the 32 B/row coord stream)
    alive_idx = (4
                 + c[:, 5].astype(jnp.int32) * N_ENEMIES
                 + c[:, 6].astype(jnp.int32) * (N_AGENTS - 1)).reshape(ba, 1)

    # row tiling: sublane-aligned tile, padded rows up to a multiple of the tile.
    # For multi-tile grids keep an even tile count so v7x's two TCs share the "parallel" axis.
    tm = min(TM_MAX, _round_up(ba, 8))
    n_tiles = -(-ba // tm)
    if n_tiles > 1 and n_tiles % 2 == 1:
        n_tiles += 1
        tm = _round_up(-(-ba // n_tiles), 8)
    ba_pad = tm * n_tiles
    if ba_pad != ba:
        pad = ba_pad - ba
        x = jnp.pad(x, ((0, pad), (0, 0)))
        alive_idx = jnp.pad(alive_idx, ((0, pad), (0, 0)))
        h = jnp.pad(h, ((0, pad), (0, 0)))

    grid = (n_tiles,)
    row_spec = lambda cols: pl.BlockSpec((tm, cols), lambda i: (i, 0))
    full_spec = lambda arr: pl.BlockSpec(arr.shape, lambda i: (0, 0))  # resident, DMA'd once

    packed = pl.pallas_call(
        partial(_fused_kernel, hidden_dim=RNN_HIDDEN_DIM,
                q_llm_off=Q_LLM_OFFSET, h_off=H_OFFSET),
        out_shape=jax.ShapeDtypeStruct((ba_pad, OUT_WIDTH), jnp.float32),
        grid_spec=pltpu.PrefetchScalarGridSpec(
            num_scalar_prefetch=0,
            grid=grid,
            in_specs=[
                row_spec(e), row_spec(1), row_spec(RNN_HIDDEN_DIM),
                full_spec(pparams["w1"]), full_spec(pparams["b1"]),
                full_spec(pparams["wgi"]), full_spec(pparams["wgh"]),
                full_spec(pparams["bg"]),
                full_spec(pparams["w2p"]), full_spec(pparams["b2p"]),
            ],
            out_specs=row_spec(OUT_WIDTH),
        ),
        compiler_params=pltpu.CompilerParams(dimension_semantics=("parallel",)),
    )(x, alive_idx, h,
      pparams["w1"], pparams["b1"],
      pparams["wgi"], pparams["wgh"], pparams["bg"],
      pparams["w2p"], pparams["b2p"])

    q_net = packed[:ba, :N_ACTIONS].reshape(b, a, N_ACTIONS)
    q_llm = packed[:ba, Q_LLM_OFFSET:Q_LLM_OFFSET + N_ACTIONS].reshape(b, a, N_ACTIONS)
    h_out = packed[:ba, H_OFFSET:H_OFFSET + RNN_HIDDEN_DIM].reshape(b, a, RNN_HIDDEN_DIM)
    # TODO(synk): if this cell is ever unrolled over a sequence, move the time loop
    # inside the kernel (trailing "arbitrary" grid axis + VMEM-resident h accumulator)
    # so h never round-trips through HBM per step.
    return q_llm, q_net, h_out


if __name__ == "__main__":
    key = jax.random.PRNGKey(0)
    k_in, k_h, k_p = jax.random.split(key, 3)

    b, a = 2, N_AGENTS
    inputs = jax.random.uniform(k_in, (b, a, INPUT_SHAPE), jnp.float32, 0.1, 1.0)
    # alive flag lives at column 4 + E_ENEMY_DIM*N_ENEMIES + E_ALLY_DIM*(N_AGENTS-1)
    alive_col = 4 + E_ENEMY_DIM * N_ENEMIES + E_ALLY_DIM * (N_AGENTS - 1)
    alive_flags = jnp.array([[0.0, 1.0, 1.0], [1.0, 0.0, 1.0]], jnp.float32)  # two dead agents
    inputs = inputs.at[:, :, alive_col].set(alive_flags)

    ava_actions = jnp.ones((b, a, N_ACTIONS), jnp.float32)
    coord = jnp.zeros((b, a, 8), jnp.float32)
    coord = coord.at[:, :, 2].set(32.0).at[:, :, 3].set(32.0)
    coord = coord.at[:, :, 5].set(float(E_ENEMY_DIM)).at[:, :, 6].set(float(E_ALLY_DIM))

    hidden = jnp.zeros((b, a, RNN_HIDDEN_DIM), jnp.float32)  # init_hidden()
    params = init_params(k_p)
    pparams = pack_params(params)

    fwd = jax.jit(nrnn_agent_forward)
    q_llm, q_net, h_out = fwd(pparams, inputs, ava_actions, coord, hidden)
    jax.block_until_ready((q_llm, q_net, h_out))

    # ---- check q_LLM against the deterministic reference semantics ----
    dead = (alive_flags == 0.0)
    expected = jnp.where(dead[..., None],
                         jax.nn.one_hot(0, N_ACTIONS, dtype=jnp.float32),
                         jnp.zeros((N_ACTIONS,), jnp.float32))
    assert q_llm.shape == (b, a, N_ACTIONS)
    assert jnp.array_equal(q_llm, expected)

    # ---- check network path against a pure-JAX f32 reference ----
    # (kernel uses bf16 MXU operands with f32 accumulation -> loosened tolerance)
    def ref_net(x, h):
        y = jnp.maximum(x @ params["w1"] + params["b1"], 0.0)
        gi = y @ params["w_ih"] + params["b_ih"]
        gh = h @ params["w_hh"] + params["b_hh"]
        H = RNN_HIDDEN_DIM
        r = jax.nn.sigmoid(gi[:, :H] + gh[:, :H])
        z = jax.nn.sigmoid(gi[:, H:2 * H] + gh[:, H:2 * H])
        n = jnp.tanh(gi[:, 2 * H:] + r * gh[:, 2 * H:])
        hn = (1.0 - z) * n + z * h
        return hn @ params["w2"] + params["b2"], hn

    q_ref, h_ref = ref_net(inputs.reshape(-1, INPUT_SHAPE), hidden.reshape(-1, RNN_HIDDEN_DIM))
    assert jnp.allclose(q_net.reshape(-1, N_ACTIONS), q_ref, atol=3e-2, rtol=3e-2)
    assert jnp.allclose(h_out.reshape(-1, RNN_HIDDEN_DIM), h_ref, atol=3e-2, rtol=3e-2)

    print("KERNEL_OK")
</pallas_src>

<mosaic_0001>
module attributes {stable_mosaic.version = 11 : i64} {
  func.func @_fused_kernel(%arg0: i32, %arg1: memref<8x32xf32, #tpu.memory_space<vmem>>, %arg2: memref<8x1xi32, #tpu.memory_space<vmem>>, %arg3: memref<8x32xf32, #tpu.memory_space<vmem>>, %arg4: memref<32x32xbf16, #tpu.memory_space<vmem>>, %arg5: memref<1x32xf32, #tpu.memory_space<vmem>>, %arg6: memref<32x128xbf16, #tpu.memory_space<vmem>>, %arg7: memref<32x128xbf16, #tpu.memory_space<vmem>>, %arg8: memref<1x128xf32, #tpu.memory_space<vmem>>, %arg9: memref<32x128xbf16, #tpu.memory_space<vmem>>, %arg10: memref<1x128xf32, #tpu.memory_space<vmem>>, %arg11: memref<8x128xf32, #tpu.memory_space<vmem>>) attributes {dimension_semantics = [#tpu.dimension_semantics<parallel>], iteration_bounds = array<i64: 1>, scalar_prefetch = 0 : i64, scratch_operands = 0 : i64, tpu.core_type = #tpu.core_type<tc>, window_params = [{transform_indices = @transform_0, window_bounds = array<i64: 8, 32>}, {transform_indices = @transform_1, window_bounds = array<i64: 8, 1>}, {transform_indices = @transform_2, window_bounds = array<i64: 8, 32>}, {pipeline_mode = #tpu.pipeline_mode<synchronous>, transform_indices = @transform_3, window_bounds = array<i64: 32, 32>}, {pipeline_mode = #tpu.pipeline_mode<synchronous>, transform_indices = @transform_4, window_bounds = array<i64: 1, 32>}, {pipeline_mode = #tpu.pipeline_mode<synchronous>, transform_indices = @transform_5, window_bounds = array<i64: 32, 128>}, {pipeline_mode = #tpu.pipeline_mode<synchronous>, transform_indices = @transform_6, window_bounds = array<i64: 32, 128>}, {pipeline_mode = #tpu.pipeline_mode<synchronous>, transform_indices = @transform_7, window_bounds = array<i64: 1, 128>}, {pipeline_mode = #tpu.pipeline_mode<synchronous>, transform_indices = @transform_8, window_bounds = array<i64: 32, 128>}, {pipeline_mode = #tpu.pipeline_mode<synchronous>, transform_indices = @transform_9, window_bounds = array<i64: 1, 128>}, {transform_indices = @transform_10, window_bounds = array<i64: 8, 128>}]} {
    %c0 = arith.constant 0 : index
    %c0_0 = arith.constant 0 : index
    %0 = vector.load %arg1[%c0, %c0_0] : memref<8x32xf32, #tpu.memory_space<vmem>>, vector<8x32xf32>
    %c0_1 = arith.constant 0 : index
    %c0_2 = arith.constant 0 : index
    %1 = vector.load %arg3[%c0_1, %c0_2] : memref<8x32xf32, #tpu.memory_space<vmem>>, vector<8x32xf32>
    %2 = arith.truncf %0 : vector<8x32xf32> to vector<8x32xbf16>
    %c0_3 = arith.constant 0 : index
    %c0_4 = arith.constant 0 : index
    %3 = vector.load %arg4[%c0_3, %c0_4] : memref<32x32xbf16, #tpu.memory_space<vmem>>, vector<32x32xbf16>
    %cst = arith.constant dense<0.000000e+00> : vector<8x32xf32>
    %4 = tpu.matmul %2, %3, %cst {dimension_numbers = #tpu.dot_dimension_numbers<[1], [0], [0], [1], [0, 0, 1, 1], [], []>} : vector<8x32xbf16>, vector<32x32xbf16>, vector<8x32xf32> -> vector<8x32xf32>
    %c0_5 = arith.constant 0 : index
    %c0_6 = arith.constant 0 : index
    %5 = vector.load %arg5[%c0_5, %c0_6] : memref<1x32xf32, #tpu.memory_space<vmem>>, vector<1x32xf32>
    %6 = vector.broadcast %5 : vector<1x32xf32> to vector<8x32xf32>
    %7 = arith.addf %4, %6 : vector<8x32xf32>
    %cst_7 = arith.constant 0.000000e+00 : f32
    %8 = vector.broadcast %cst_7 : f32 to vector<8x32xf32>
    %9 = arith.maximumf %7, %8 : vector<8x32xf32>
    %10 = arith.truncf %9 : vector<8x32xf32> to vector<8x32xbf16>
    %c0_8 = arith.constant 0 : index
    %c0_9 = arith.constant 0 : index
    %11 = vector.load %arg6[%c0_8, %c0_9] : memref<32x128xbf16, #tpu.memory_space<vmem>>, vector<32x128xbf16>
    %cst_10 = arith.constant dense<0.000000e+00> : vector<8x128xf32>
    %12 = tpu.matmul %10, %11, %cst_10 {dimension_numbers = #tpu.dot_dimension_numbers<[1], [0], [0], [1], [0, 0, 1, 1], [], []>} : vector<8x32xbf16>, vector<32x128xbf16>, vector<8x128xf32> -> vector<8x128xf32>
    %13 = arith.truncf %1 : vector<8x32xf32> to vector<8x32xbf16>
    %c0_11 = arith.constant 0 : index
    %c0_12 = arith.constant 0 : index
    %14 = vector.load %arg7[%c0_11, %c0_12] : memref<32x128xbf16, #tpu.memory_space<vmem>>, vector<32x128xbf16>
    %cst_13 = arith.constant dense<0.000000e+00> : vector<8x128xf32>
    %15 = tpu.matmul %13, %14, %cst_13 {dimension_numbers = #tpu.dot_dimension_numbers<[1], [0], [0], [1], [0, 0, 1, 1], [], []>} : vector<8x32xbf16>, vector<32x128xbf16>, vector<8x128xf32> -> vector<8x128xf32>
    %16 = arith.addf %12, %15 : vector<8x128xf32>
    %c0_14 = arith.constant 0 : index
    %c0_15 = arith.constant 0 : index
    %17 = vector.load %arg8[%c0_14, %c0_15] : memref<1x128xf32, #tpu.memory_space<vmem>>, vector<1x128xf32>
    %18 = vector.broadcast %17 : vector<1x128xf32> to vector<8x128xf32>
    %19 = arith.addf %16, %18 : vector<8x128xf32>
    %20 = vector.extract_strided_slice %19 {offsets = [0, 0], sizes = [8, 32], strides = [1, 1]} : vector<8x128xf32> to vector<8x32xf32>
    %21 = arith.negf %20 : vector<8x32xf32>
    %22 = math.exp %21 : vector<8x32xf32>
    %cst_16 = arith.constant 1.000000e+00 : f32
    %23 = vector.broadcast %cst_16 : f32 to vector<8x32xf32>
    %24 = arith.addf %23, %22 : vector<8x32xf32>
    %25 = arith.divf %23, %24 : vector<8x32xf32>
    %26 = vector.extract_strided_slice %19 {offsets = [0, 32], sizes = [8, 32], strides = [1, 1]} : vector<8x128xf32> to vector<8x32xf32>
    %27 = arith.negf %26 : vector<8x32xf32>
    %28 = math.exp %27 : vector<8x32xf32>
    %cst_17 = arith.constant 1.000000e+00 : f32
    %29 = vector.broadcast %cst_17 : f32 to vector<8x32xf32>
    %30 = arith.addf %29, %28 : vector<8x32xf32>
    %31 = arith.divf %29, %30 : vector<8x32xf32>
    %32 = vector.extract_strided_slice %19 {offsets = [0, 64], sizes = [8, 32], strides = [1, 1]} : vector<8x128xf32> to vector<8x32xf32>
    %33 = vector.extract_strided_slice %19 {offsets = [0, 96], sizes = [8, 32], strides = [1, 1]} : vector<8x128xf32> to vector<8x32xf32>
    %34 = arith.mulf %25, %33 : vector<8x32xf32>
    %35 = arith.addf %32, %34 : vector<8x32xf32>
    %36 = math.tanh %35 : vector<8x32xf32>
    %cst_18 = arith.constant 1.000000e+00 : f32
    %37 = vector.broadcast %cst_18 : f32 to vector<8x32xf32>
    %38 = arith.subf %37, %31 : vector<8x32xf32>
    %39 = arith.mulf %38, %36 : vector<8x32xf32>
    %40 = arith.mulf %31, %1 : vector<8x32xf32>
    %41 = arith.addf %39, %40 : vector<8x32xf32>
    %42 = arith.truncf %41 : vector<8x32xf32> to vector<8x32xbf16>
    %c0_19 = arith.constant 0 : index
    %c0_20 = arith.constant 0 : index
    %43 = vector.load %arg9[%c0_19, %c0_20] : memref<32x128xbf16, #tpu.memory_space<vmem>>, vector<32x128xbf16>
    %cst_21 = arith.constant dense<0.000000e+00> : vector<8x128xf32>
    %44 = tpu.matmul %42, %43, %cst_21 {dimension_numbers = #tpu.dot_dimension_numbers<[1], [0], [0], [1], [0, 0, 1, 1], [], []>} : vector<8x32xbf16>, vector<32x128xbf16>, vector<8x128xf32> -> vector<8x128xf32>
    %c0_22 = arith.constant 0 : index
    %c0_23 = arith.constant 0 : index
    %45 = vector.load %arg10[%c0_22, %c0_23] : memref<1x128xf32, #tpu.memory_space<vmem>>, vector<1x128xf32>
    %46 = vector.broadcast %45 : vector<1x128xf32> to vector<8x128xf32>
    %47 = arith.addf %44, %46 : vector<8x128xf32>
    %c0_24 = arith.constant 0 : index
    %c0_25 = arith.constant 0 : index
    %48 = vector.load %arg2[%c0_24, %c0_25] : memref<8x1xi32, #tpu.memory_space<vmem>>, vector<8x1xi32>
    %49 = tpu.iota {dimensions = array<i32: 1>} : vector<8x32xi32>
    %50 = vector.broadcast %48 : vector<8x1xi32> to vector<8x32xi32>
    %51 = arith.cmpi eq, %49, %50 : vector<8x32xi32>
    %cst_26 = arith.constant 0.000000e+00 : f32
    %52 = vector.broadcast %cst_26 : f32 to vector<8x32xf32>
    %53 = arith.select %51, %0, %52 : vector<8x32xi1>, vector<8x32xf32>
    %cst_27 = arith.constant dense<0.000000e+00> : vector<8xf32>
    %54 = vector.multi_reduction <add>, %53, %cst_27 [1] : vector<8x32xf32> to vector<8xf32>
    %55 = vector.shape_cast %54 : vector<8xf32> to vector<8x1xf32>
    %cst_28 = arith.constant 0.000000e+00 : f32
    %56 = vector.broadcast %cst_28 : f32 to vector<8x1xf32>
    %57 = arith.cmpf oeq, %55, %56 : vector<8x1xf32>
    %58 = arith.extui %57 : vector<8x1xi1> to vector<8x1xi32>
    %59 = arith.sitofp %58 : vector<8x1xi32> to vector<8x1xf32>
    %60 = tpu.iota {dimensions = array<i32: 1>} : vector<1x128xi32>
    %c64_i32 = arith.constant 64 : i32
    %61 = vector.broadcast %c64_i32 : i32 to vector<1x128xi32>
    %62 = arith.cmpi eq, %60, %61 : vector<1x128xi32>
    %63 = arith.extui %62 : vector<1x128xi1> to vector<1x128xi32>
    %64 = arith.sitofp %63 : vector<1x128xi32> to vector<1x128xf32>
    %cst_29 = arith.constant 0.000000e+00 : f32
    %65 = vector.broadcast %cst_29 : f32 to vector<8x96xf32>
    %66 = tpu.concatenate %65, %41 in 1 : vector<8x96xf32>, vector<8x32xf32> -> vector<8x128xf32>
    %67 = vector.broadcast %59 : vector<8x1xf32> to vector<8x128xf32>
    %68 = vector.broadcast %64 : vector<1x128xf32> to vector<8x128xf32>
    %69 = arith.mulf %67, %68 : vector<8x128xf32>
    %70 = arith.addf %47, %69 : vector<8x128xf32>
    %71 = arith.addf %70, %66 : vector<8x128xf32>
    %c0_30 = arith.constant 0 : index
    %c0_31 = arith.constant 0 : index
    %72 = vector.load %arg11[%c0_30, %c0_31] : memref<8x128xf32, #tpu.memory_space<vmem>>, vector<8x128xf32>
    tpu.vector_store %arg11[%c0_30, %c0_31], %71 {strides = array<i32>} : memref<8x128xf32, #tpu.memory_space<vmem>>, vector<8x128xf32>,
    return
  }
  func.func @transform_0(%arg0: i32) -> (i32, i32) {
    %c0_i32 = arith.constant 0 : i32
    %c0_i32_0 = arith.constant 0 : i32
    return %arg0, %c0_i32 : i32, i32
  }
  func.func @transform_1(%arg0: i32) -> (i32, i32) {
    %c0_i32 = arith.constant 0 : i32
    %c0_i32_0 = arith.constant 0 : i32
    return %arg0, %c0_i32 : i32, i32
  }
  func.func @transform_2(%arg0: i32) -> (i32, i32) {
    %c0_i32 = arith.constant 0 : i32
    %c0_i32_0 = arith.constant 0 : i32
    return %arg0, %c0_i32 : i32, i32
  }
  func.func @transform_3(%arg0: i32) -> (i32, i32) {
    %c0_i32 = arith.constant 0 : i32
    %c0_i32_0 = arith.constant 0 : i32
    %c0_i32_1 = arith.constant 0 : i32
    return %c0_i32, %c0_i32_0 : i32, i32
  }
  func.func @transform_4(%arg0: i32) -> (i32, i32) {
    %c0_i32 = arith.constant 0 : i32
    %c0_i32_0 = arith.constant 0 : i32
    %c0_i32_1 = arith.constant 0 : i32
    return %c0_i32, %c0_i32_0 : i32, i32
  }
  func.func @transform_5(%arg0: i32) -> (i32, i32) {
    %c0_i32 = arith.constant 0 : i32
    %c0_i32_0 = arith.constant 0 : i32
    %c0_i32_1 = arith.constant 0 : i32
    return %c0_i32, %c0_i32_0 : i32, i32
  }
  func.func @transform_6(%arg0: i32) -> (i32, i32) {
    %c0_i32 = arith.constant 0 : i32
    %c0_i32_0 = arith.constant 0 : i32
    %c0_i32_1 = arith.constant 0 : i32
    return %c0_i32, %c0_i32_0 : i32, i32
  }
  func.func @transform_7(%arg0: i32) -> (i32, i32) {
    %c0_i32 = arith.constant 0 : i32
    %c0_i32_0 = arith.constant 0 : i32
    %c0_i32_1 = arith.constant 0 : i32
    return %c0_i32, %c0_i32_0 : i32, i32
  }
  func.func @transform_8(%arg0: i32) -> (i32, i32) {
    %c0_i32 = arith.constant 0 : i32
    %c0_i32_0 = arith.constant 0 : i32
    %c0_i32_1 = arith.constant 0 : i32
    return %c0_i32, %c0_i32_0 : i32, i32
  }
  func.func @transform_9(%arg0: i32) -> (i32, i32) {
    %c0_i32 = arith.constant 0 : i32
    %c0_i32_0 = arith.constant 0 : i32
    %c0_i32_1 = arith.constant 0 : i32
    return %c0_i32, %c0_i32_0 : i32, i32
  }
  func.func @transform_10(%arg0: i32) -> (i32, i32) {
    %c0_i32 = arith.constant 0 : i32
    %c0_i32_0 = arith.constant 0 : i32
    return %arg0, %c0_i32 : i32, i32
  }
}

</mosaic_0001>

<bundles_post_ra>
// kernel: nrnn_agent_forward.1
= control target key start
LH: loop header
LB: loop body
LE: loop exit
PB: predicated region body
PF: predicated region fallthrough
CT: control target
= control target key end

     0   :  { %v449_v0 = vmov 0.0   ;;  %vm450_vm0 = vmmov 0   ;;  %vm62_vm1 = vcmask 261120   ;;  %s452_s28 = smov 64   ;;  %v453_v36 = vmov 0   ;;  %s454_s30 = smov 96   ;;  %s583_s3 = inlined_call_operand.vmem [shape: bf16[32,32], index: 3, kind: input, shape index: {}]   ;;  %s584_s0 = inlined_call_operand.vmem [shape: f32[8,32], index: 0, kind: input, shape index: {}]   ;;  %s585_s6 = inlined_call_operand.vmem [shape: bf16[32,128], index: 6, kind: input, shape index: {}]   ;;  %s586_s5 = inlined_call_operand.vmem [shape: bf16[32,128], index: 5, kind: input, shape index: {}]   ;;  %s587_s2 = inlined_call_operand.vmem [shape: f32[8,32], index: 2, kind: input, shape index: {}]   ;;  %s588_s4 = inlined_call_operand.vmem [shape: f32[1,32], index: 4, kind: input, shape index: {}]   ;;  %s589_s7 = inlined_call_operand.vmem [shape: f32[1,128], index: 7, kind: input, shape index: {}]   ;;  %s590_s8 = inlined_call_operand.vmem [shape: bf16[32,128], index: 8, kind: input, shape index: {}]   ;;  %s591_s1 = inlined_call_operand.vmem [shape: s32[8,1], index: 1, kind: input, shape index: {}]   ;;  %s592_s9 = inlined_call_operand.vmem [shape: f32[1,128], index: 9, kind: input, shape index: {}]   ;;  %s593_s10 = inlined_call_operand.vmem [shape: f32[8,128], index: 10, kind: output, shape index: {}]  }
   0x1   :  { %395 = vmatprep.subr.bf16.mxu0 %v449_v0  ;;  %v435_v1 = vld [vmem:[%s583_s3] sm:$0xff]   ;;  %399 = vmatprep.mubr.msk.bf16.mxu0 %vm450_vm0, %v449_v0  ;;  %v436_v2 = vld [vmem:[%s583_s3 + $0x8] sm:$0xff]   ;;  %v335_v50 = vlaneseq  ;;  %vm355_vm5 = vcmask 785408  }
   0x2   :  { %403 = vmatprep.subr.bf16.mxu1 %v449_v0  ;;  %407 = vmatprep.mubr.msk.bf16.mxu1 %vm450_vm0, %v449_v0  ;;  %v525_v3 = vld [vmem:[%s584_s0] sm:$0xff]  ;;  %v439_v7 = vld [vmem:[%s585_s6 + $0x8] sm:$0xff]  }
   0x3   :  { %396 = vmatpush3.bf16.msra.mxu0 %v435_v1  ;;  %v437_v4 = vld [vmem:[%s585_s6] sm:$0xff]   ;;  %v38_v5 = vpack.c.bf16 %v525_v3, %v525_v3  ;;  %v440_v9 = vld [vmem:[%s586_s5 + $0x8] sm:$0xff]   ;;  %433 = vset.pattern.permute.xlu1 %v453_v36  ;;  %v336_v51 = vand.u32 127, %v335_v50 }
   0x4   :  { %397 = vmatprep.subr.bf16.mxu0 %v449_v0  ;;  %404 = vmatpush3.bf16.msra.mxu1 %v437_v4  ;;  %v438_v6 = vld [vmem:[%s586_s5] sm:$0xff]   ;;  %v442_v42 = vld [vmem:[%s590_s8 + $0x8] sm:$0xff]  }
   0x5   :  { %405 = vmatprep.subr.bf16.mxu1 %v449_v0  ;;  %v37_v8 = vld [vmem:[%s587_s2] sm:$0xff]  ;;  %434 = vset.pattern.permute.xlu0 %v453_v36  ;;  %vm348_vm3 = vcmp.eq.s32.totalorder %v336_v51, 64 }
   0x6   :  { %v112_v10 = vpack.c.bf16 %v37_v8, %v37_v8  ;;  %v365_v11 = vld [vmem:[%s588_s4] ss:$0 sm:$0xff]  ;;  %s451_s4 = smov 32   ;;  %v382_v57 = vsel %vm348_vm3, 1.0, %v449_v0 }
   0x7   :  { %398 = vmatpush3.bf16.msra.mxu0 %v436_v2  ;;  %v375_v24 = vld [vmem:[%s589_s7] ss:$0 sm:$0xff] }
   0x8   :  { %411 = vmatprep.subr.bf16.mxu0 %v449_v0  ;;  %406 = vmatpush3.bf16.msra.mxu1 %v439_v7  ;;  %v441_v39 = vld [vmem:[%s590_s8] sm:$0xff]  }
   0x9   :  { %419 = vmatprep.subr.bf16.mxu1 %v449_v0  ;;  %v334_v41 = vld [vmem:[%s591_s1] sm:$0xff] }
   0xa   :  { %400 = vmatmul.mubr.msk.bf16.vlgmr.msra.gmra.mrb[0].mxu0 %vm62_vm1, %v38_v5  ;;  %v377_v59 = vld [vmem:[%s592_s9] ss:$0 sm:$0xff] }
   0xb   :  { %412 = vmatpush3.bf16.msra.mxu0 %v438_v6  ;;  %415 = vmatprep.mubr.msk.bf16.mxu0 %vm450_vm0, %v449_v0 }
   0xc   :  { %413 = vmatprep.subr.bf16.mxu0 %v449_v0  ;;  %408 = vmatmul.mubr.msk.bf16.vlgmr.msra.gmra.mrb[0].mxu1 %vm62_vm1, %v112_v10 }
   0xd   :  { %423 = vmatprep.mubr.msk.bf16.mxu1 %vm450_vm0, %v449_v0  ;;  %420 = vmatpush3.bf16.msra.mxu1 %v441_v39 }
   0xe   :  { %421 = vmatprep.subr.bf16.mxu1 %v449_v0 }
   0xf   :  { %414 = vmatpush3.bf16.msra.mxu0 %v440_v9 }
  0x11   :  { %422 = vmatpush3.bf16.msra.mxu1 %v442_v42 }
  0xdd   :  { %v100_v12 = vpop.f32.mrb[0].mxu0 }
  0xde   :  { %v101_v13 = vadd.f32 %v365_v11, %v100_v12  ;;  %v401_v14 = vpop.f32.mrb[1].mxu0 }
  0xdf   :  { %v103_v15 = vpop.f32.mrb[2].mxu0  ;;  %v166_v19 = vpop.f32.mrb[0].mxu1 }
  0xe0   :  { %v106_v16 = vmax.f32 %v101_v13, 0.0  ;;  %v402_v17 = vpop.f32.mrb[3].mxu0  ;;  %v409_v20 = vpop.f32.mrb[1].mxu1 }
  0xe1   :  { %v169_v21 = vpop.f32.mrb[2].mxu1 }
  0xe2   :  { %v107_v18 = vpack.c.bf16 %v106_v16, %v106_v16  ;;  %v410_v22 = vpop.f32.mrb[3].mxu1 }
  0xe4   :  { %416 = vmatmul.mubr.msk.bf16.vlgmr.msra.gmra.mrb[4].mxu0 %vm62_vm1, %v107_v18 }
 0x1b7   :  { %v221_v23 = vpop.f32.mrb[4].mxu0 }
 0x1b8   :  { %v222_v25 = vadd.f32 %v221_v23, %v166_v19  ;;  %v417_v26 = vpop.f32.mrb[5].mxu0 }
 0x1b9   :  { %v224_v27 = vpop.f32.mrb[6].mxu0 }
 0x1ba   :  { %v234_v28 = vadd.f32 %v375_v24, %v222_v25  ;;  %v418_v29 = vpop.f32.mrb[7].mxu0 }
 0x1bc   :  { %242 = vrot.lane.b32.xlu0 %v234_v28, %s451_s4  ;;  %v376_v30 = vmul.f32 -1.442695, %v234_v28 }
 0x1be   :  { %443 = vpow2.f32 %v376_v30 }
 0x1c8   :  { %v444_v31 = vpop.eup %443 }
 0x1c9   :  { %v238_v32 = vadd.f32 1.0, %v444_v31 }
 0x1cb   :  { %445 = vrcp.f32 %v238_v32 }
 0x1d5   :  { %v446_v33 = vpop.eup %445 }
 0x1d6   :  { %v252_v44 = vsub.f32 1.0, %v446_v33 }
 0x22e   :  { %v243_v34 = vpop.permute.xlu0 %242 }
 0x22f   :  { %v245_v35 = vmul.f32 %v446_v33, %v243_v34 }
 0x231   :  { %247 = vrot.lane.b32.xlu0 %v245_v35, %s452_s28 }
 0x2a3   :  { %v248_v37 = vpop.permute.xlu0 %247 }
 0x2a4   :  { %v250_v38 = vadd.f32 %v248_v37, %v234_v28 }
 0x2a6   :  { %447 = vtanh.f32 %v250_v38 }
 0x2b0   :  { %v448_v40 = vpop.eup %447 }
 0x2b1   :  { %254 = vrot.lane.b32.xlu1 %v448_v40, %s454_s30 }
 0x2b5   :  { %259 = vrot.lane.b32.xlu1 %v37_v8, %s451_s4 }
 0x2b9   :  { %338 = vperm.xlu1 %433, %v334_v41  }
 0x323   :  { %v255_v43 = vpop.permute.xlu1 %254 }
 0x324   :  { %v257_v46 = vmul.f32 %v255_v43, %v252_v44 }
 0x327   :  { %v260_v45 = vpop.permute.xlu1 %259 }
 0x328   :  { %v262_v47 = vmul.f32 %v446_v33, %v260_v45 }
 0x32a   :  { %v263_v48 = vadd.f32 %v262_v47, %v257_v46 }
 0x32c   :  { %352 = vrot.lane.b32.xlu1 %v263_v48, %s452_s28  ;;  %v264_v49 = vpack.c.bf16 %v263_v48, %v263_v48 }
 0x32e   :  { %277 = vrot.lane.b32.xlu0 %v264_v49, %s454_s30 }
 0x338   :  { %v339_v52 = vpop.permute.xlu1 %338 }
 0x339   :  { %vm340_vm2 = vcmp.eq.s32.totalorder %v336_v51, %v339_v52 }
 0x33a   :  { %v341_v53 = vsel %vm340_vm2, %v525_v3, 0.0 }
 0x33b   :  { %v342_v54 = vsel %vm62_vm1, %v341_v53, 0.0 }
 0x34d   :  { %343 = vadd.xlane.f32.xlu0 %v342_v54 }
 0x39e   :  { %v353_v62 = vpop.permute.xlu1 %352 }
 0x39f   :  { %v356_v5 = vsel %vm355_vm5, 0.0, %v353_v62 }
 0x3a0   :  { %v278_v55 = vpop.permute.xlu0 %277 }
 0x3a1   :  { %424 = vmatmul.mubr.msk.bf16.vlgmr.msra.gmra.mrb[4].mxu1 %vm62_vm1, %v278_v55 }
 0x3da   :  { %v344_v56 = vpop.xlane.xlu0 %343 }
 0x3db   :  { %vm345_vm4 = vcmp.eq.f32.partialorder %v344_v56, 0.0 }
 0x3dc   :  { %v381_v58 = vsel %vm345_vm4, 1.0, %v449_v0 }
 0x3dd   :  { %v357_v60 = vmul.f32 %v382_v57, %v381_v58 }
 0x474   :  { %v328_v61 = vpop.f32.mrb[4].mxu1 }
 0x475   :  { %v329_v63 = vadd.f32 %v377_v59, %v328_v61  ;;  %v425_v1 = vpop.f32.mrb[5].mxu1 }
 0x476   :  { %v331_v2 = vpop.f32.mrb[6].mxu1 }
 0x477   :  { %v358_v3 = vadd.f32 %v357_v60, %v329_v63  ;;  %v426_v4 = vpop.f32.mrb[7].mxu1 }
 0x479   :  { %v359_v6 = vadd.f32 %v358_v3, %v356_v5 }
 0x47b   :  { %360 = vst [vmem:[%s593_s10] sm:$0xff] %v359_v6 }

</bundles_post_ra>
